<compile_context>
chip_gen: v7x
topology: tpu7x:2x2x1
jax: 0.10.0
libtpu: 0.0.40
codegen_flags: <defaults>
</compile_context>

<pallas_src>
import math
import functools

import jax
import jax.numpy as jnp
from jax.experimental import pallas as pl
from jax.experimental.pallas import tpu as pltpu


def _sia_kernel(x1_ref, xd_ref, h_ref, wk_ref, wvm_ref, wqt_ref,
                segsum_ref, expp_ref, tilev_ref, out_ref, nnp_ref, *, scale):
    """One batch tile (Bt examples) per grid step.  All heavy ops are MXU matmuls.

    x1_ref    : (Bt, D_in)        x[:, 1, :]
    xd_ref    : (Bt, D_in)        x[:, 0, :] - x[:, 1, :]
    h_ref     : (Bt, NB*Hd)       h flattened (row-major: n*Hd + h)
    wk_ref    : (D_in, H*kdim)    key weight
    wvm_ref   : (D_in, vdim)      value weight pre-averaged over heads (exact fold)
    wqt_ref   : (H*kdim, NB*Hd)   GroupLinear weight, reshaped (NB*Hd, H*kdim) and transposed
    segsum_ref: (NB*Hd, NB)       0/1 per-block segment-sum matrix
    expp_ref  : (NB, NB*vdim)     0/1 "repeat each prob vdim times" matrix
    tilev_ref : (vdim, NB*vdim)   0/1 "tile value NB times" matrix
    out_ref   : (Bt, NB*vdim)     lane-dense flattened output
    nnp_ref   : (Bt, NB)          attention prob of key 0 ("not null" prob)
    """
    f32 = jnp.float32
    x1 = x1_ref[...]
    xd = xd_ref[...]
    h2 = h_ref[...]

    # Projections: single MXU matmuls with f32 accumulation.
    kdiff = jnp.dot(xd, wk_ref[...], preferred_element_type=f32)    # (Bt, H*kdim) = key0-key1
    v1    = jnp.dot(x1, wvm_ref[...], preferred_element_type=f32)   # (Bt, vdim)   = head-mean value of x[:,1]
    vdiff = jnp.dot(xd, wvm_ref[...], preferred_element_type=f32)   # (Bt, vdim)   = value0 - value1

    # GroupLinear query fused into the head-averaged score difference:
    #   (s0 - s1)[b,n] = scale * sum_h h[b,n,h] * (Wq[n,h,:] . kdiff[b,:])
    w2 = jnp.dot(kdiff, wqt_ref[...], preferred_element_type=f32)   # (Bt, NB*Hd)  MXU
    prod = h2.astype(f32) * w2                                      # (Bt, NB*Hd)  VPU
    s_diff = scale * jnp.dot(prod, segsum_ref[...],                 # (Bt, NB)     per-block sum on MXU
                             preferred_element_type=f32)

    # Softmax over the 2 keys == sigmoid of the score difference.
    p0 = 1.0 / (1.0 + jnp.exp(-s_diff))                             # (Bt, NB)  prob of key 0

    # inputs[b,n,:] = p0*value0 + (1-p0)*value1 = value1 + p0*(value0 - value1),
    # produced directly in lane-dense flattened (Bt, NB*vdim) layout via constant
    # 0/1 expansion matmuls (no in-kernel reshapes, unmasked full-lane stores).
    p0_rep = jnp.dot(p0, expp_ref[...], preferred_element_type=f32)      # (Bt, NB*vdim)
    v1_rep = jnp.dot(v1, tilev_ref[...], preferred_element_type=f32)     # (Bt, NB*vdim)
    vd_rep = jnp.dot(vdiff, tilev_ref[...], preferred_element_type=f32)  # (Bt, NB*vdim)

    out_ref[...] = (v1_rep + p0_rep * vd_rep).astype(out_ref.dtype)
    nnp_ref[...] = p0.astype(nnp_ref.dtype)


def _pick_batch_tile(bs):
    """Largest power-of-two-ish multiple-of-8 tile dividing bs, keeping >=2 grid
    steps when possible (so both v7x TensorCores get work) and a modest VMEM footprint."""
    if bs % 8:
        return bs                      # single block equal to the full batch dim
    t = 8
    while t * 2 <= 128 and bs % (t * 2) == 0 and bs // (t * 2) >= 2:
        t *= 2
    return t


def sparse_input_attention(x, h, params, *, num_heads, kdim, vdim,
                           batch_tile=None, compute_dtype=None):
    bs, nk, d_in = x.shape
    _, nb, hd = h.shape
    assert nk == 2, "SparseInputAttention expects x of shape (batch, 2, input_size)"
    hk = num_heads * kdim

    wk = params["w_key"]          # (d_in, H*kdim)
    wv = params["w_value"]        # (d_in, H*vdim)
    wq = params["w_query"]        # (nb, hd, H*kdim)

    # --- exact algebraic folds done once in the wrapper (cheap XLA glue) ---
    # mean over heads of the value projection -> averaged weight
    wv_mean = wv.reshape(d_in, num_heads, vdim).mean(axis=1)              # (d_in, vdim)
    # GroupLinear weight laid out for the fused score computation
    wq_t = wq.reshape(nb * hd, hk).T                                      # (hk, nb*hd)
    # two-way softmax only needs row0 - row1 of key/value
    x1 = x[:, 1, :]                                                       # (bs, d_in)
    xd = x[:, 0, :] - x1                                                  # (bs, d_in)
    h_flat = h.reshape(bs, nb * hd)                                       # (bs, nb*hd)

    # constant 0/1 structure matrices (kept f32: their matmuls are exact)
    segsum = jnp.kron(jnp.eye(nb, dtype=jnp.float32), jnp.ones((hd, 1), jnp.float32))   # (nb*hd, nb)
    expp   = jnp.kron(jnp.eye(nb, dtype=jnp.float32), jnp.ones((1, vdim), jnp.float32)) # (nb, nb*vdim)
    tilev  = jnp.kron(jnp.ones((1, nb), jnp.float32), jnp.eye(vdim, dtype=jnp.float32)) # (vdim, nb*vdim)

    if compute_dtype is not None:
        # e.g. jnp.bfloat16 operands on v6e/v7x; accumulation stays f32 in-kernel.
        x1, xd, h_flat = (a.astype(compute_dtype) for a in (x1, xd, h_flat))
        wk, wv_mean, wq_t = (w.astype(compute_dtype) for w in (wk, wv_mean, wq_t))

    if batch_tile is None:
        batch_tile = _pick_batch_tile(bs)
    assert bs % batch_tile == 0, "batch_tile must divide the batch size"
    grid = (bs // batch_tile,)

    scale = 1.0 / (num_heads * math.sqrt(kdim))
    kernel = functools.partial(_sia_kernel, scale=scale)

    out_shapes = (
        jax.ShapeDtypeStruct((bs, nb * vdim), jnp.float32),   # lane-dense main output
        jax.ShapeDtypeStruct((bs, nb), jnp.float32),          # not_null_probs
    )

    # NOTE: the weight/constant BlockSpecs have constant index_maps so they are DMA'd
    # once; at these sizes (<1 MiB total) double-buffering is irrelevant.  For much
    # larger weights they could be single-buffered (pipeline_mode=pl.Buffered(1)) or
    # preloaded into VMEM scratch.
    out_flat, nnp = pl.pallas_call(
        kernel,
        out_shape=out_shapes,
        grid_spec=pltpu.PrefetchScalarGridSpec(
            num_scalar_prefetch=0,
            grid=grid,
            in_specs=[
                pl.BlockSpec((batch_tile, d_in), lambda i: (i, 0)),       # x1
                pl.BlockSpec((batch_tile, d_in), lambda i: (i, 0)),       # xdiff
                pl.BlockSpec((batch_tile, nb * hd), lambda i: (i, 0)),    # h_flat
                pl.BlockSpec((d_in, hk), lambda i: (0, 0)),               # wk
                pl.BlockSpec((d_in, vdim), lambda i: (0, 0)),             # wv_mean
                pl.BlockSpec((hk, nb * hd), lambda i: (0, 0)),            # wq_t
                pl.BlockSpec((nb * hd, nb), lambda i: (0, 0)),            # segsum
                pl.BlockSpec((nb, nb * vdim), lambda i: (0, 0)),          # expp
                pl.BlockSpec((vdim, nb * vdim), lambda i: (0, 0)),        # tilev
            ],
            out_specs=[
                pl.BlockSpec((batch_tile, nb * vdim), lambda i: (i, 0)),
                pl.BlockSpec((batch_tile, nb), lambda i: (i, 0)),
            ],
        ),
        compiler_params=pltpu.CompilerParams(
            dimension_semantics=("parallel",)),
    )(x1, xd, h_flat, wk, wv_mean, wq_t, segsum, expp, tilev)

    inputs = out_flat.reshape(bs, nb, vdim)
    mask = jnp.ones((bs, nb), jnp.float32)          # eval-mode mask == 1 (compile-time constant)
    not_null_probs = nnp
    reg_loss = jnp.zeros((1,), jnp.float32)
    return inputs, mask, not_null_probs, reg_loss


def _reference(x, h, params, *, num_heads, kdim, vdim):
    """Pure-JAX reference following the torch forward (eval mode) literally."""
    bs, nk, d_in = x.shape
    _, nb, hd = h.shape
    wk, wv, wq = params["w_key"], params["w_value"], params["w_query"]

    key = jnp.einsum("bnd,dk->bnk", x, wk)                       # (bs, 2, H*kdim)
    value = jnp.einsum("bnd,dk->bnk", x, wv)                     # (bs, 2, H*vdim)
    query = jnp.einsum("bnh,nhd->bnd", h, wq)                    # (bs, NB, H*kdim)

    key_h = key.reshape(bs, nk, num_heads, kdim).transpose(0, 2, 1, 3)       # (bs,H,2,kdim)
    val_h = value.reshape(bs, nk, num_heads, vdim).transpose(0, 2, 1, 3)     # (bs,H,2,vdim)
    val_m = val_h.mean(axis=1)                                               # (bs,2,vdim)
    q_h = query.reshape(bs, nb, num_heads, kdim).transpose(0, 2, 1, 3)       # (bs,H,NB,kdim)

    scores = jnp.einsum("bhnk,bhmk->bhnm", q_h, key_h) / math.sqrt(kdim)
    scores = scores.mean(axis=1)                                             # (bs,NB,2)
    probs = jax.nn.softmax(scores, axis=-1)
    inputs = jnp.einsum("bnm,bmv->bnv", probs, val_m)
    mask = jnp.ones((bs, nb), jnp.float32)
    return inputs, mask, probs[:, :, 0], jnp.zeros((1,), jnp.float32)


if __name__ == "__main__":
    # small shapes consistent with the module: x = (bs, 2, input_size), h = (bs, NB, hidden)
    bs, input_size, hidden_size = 16, 32, 32
    num_heads, kdim, vdim, num_blocks = 4, 16, 32, 8

    root = jax.random.PRNGKey(0)
    k_x, k_h, k_wk, k_wv, k_wq, k_la, k_lb = jax.random.split(root, 7)

    x = jax.random.normal(k_x, (bs, 2, input_size), jnp.float32)
    h = jax.random.normal(k_h, (bs, num_blocks, hidden_size), jnp.float32)

    params = {
        # nn.Linear(input_size, num_heads*kdim, bias=False), stored transposed (in, out)
        "w_key": jax.random.normal(k_wk, (input_size, num_heads * kdim), jnp.float32)
                 / math.sqrt(input_size),
        "w_value": jax.random.normal(k_wv, (input_size, num_heads * vdim), jnp.float32)
                   / math.sqrt(input_size),
        # GroupLinearLayer(hidden_size, kdim*num_heads, num_blocks): 0.01 * randn
        "w_query": 0.01 * jax.random.normal(
            k_wq, (num_blocks, hidden_size, num_heads * kdim), jnp.float32),
        # Beta-prior parameters (training branch only; kept for completeness)
        "log_alpha": math.log(3.0) + 0.1 * jax.random.normal(k_la, (num_blocks,), jnp.float32),
        "log_beta": math.log(2.0) + 0.1 * jax.random.normal(k_lb, (num_blocks,), jnp.float32),
    }

    out = sparse_input_attention(x, h, params, num_heads=num_heads, kdim=kdim, vdim=vdim)
    out = jax.block_until_ready(out)
    inputs, mask, nnp, reg_loss = out

    ref_inputs, ref_mask, ref_nnp, ref_reg = _reference(
        x, h, params, num_heads=num_heads, kdim=kdim, vdim=vdim)

    assert inputs.shape == (bs, num_blocks, vdim)
    assert mask.shape == (bs, num_blocks)
    assert nnp.shape == (bs, num_blocks)
    assert reg_loss.shape == (1,)
    assert jnp.allclose(inputs, ref_inputs, rtol=1e-4, atol=1e-5)
    assert jnp.allclose(mask, ref_mask)
    assert jnp.allclose(nnp, ref_nnp, rtol=1e-4, atol=1e-5)

    print("KERNEL_OK")
</pallas_src>

<mosaic_0001>
module attributes {stable_mosaic.version = 11 : i64} {
  func.func @_sia_kernel(%arg0: i32, %arg1: memref<8x32xf32, #tpu.memory_space<vmem>>, %arg2: memref<8x32xf32, #tpu.memory_space<vmem>>, %arg3: memref<8x256xf32, #tpu.memory_space<vmem>>, %arg4: memref<32x64xf32, #tpu.memory_space<vmem>>, %arg5: memref<32x32xf32, #tpu.memory_space<vmem>>, %arg6: memref<64x256xf32, #tpu.memory_space<vmem>>, %arg7: memref<256x8xf32, #tpu.memory_space<vmem>>, %arg8: memref<8x256xf32, #tpu.memory_space<vmem>>, %arg9: memref<32x256xf32, #tpu.memory_space<vmem>>, %arg10: memref<8x256xf32, #tpu.memory_space<vmem>>, %arg11: memref<8x8xf32, #tpu.memory_space<vmem>>) attributes {dimension_semantics = [#tpu.dimension_semantics<parallel>], iteration_bounds = array<i64: 2>, scalar_prefetch = 0 : i64, scratch_operands = 0 : i64, tpu.core_type = #tpu.core_type<tc>, window_params = [{transform_indices = @transform_0, window_bounds = array<i64: 8, 32>}, {transform_indices = @transform_1, window_bounds = array<i64: 8, 32>}, {transform_indices = @transform_2, window_bounds = array<i64: 8, 256>}, {pipeline_mode = #tpu.pipeline_mode<synchronous>, transform_indices = @transform_3, window_bounds = array<i64: 32, 64>}, {pipeline_mode = #tpu.pipeline_mode<synchronous>, transform_indices = @transform_4, window_bounds = array<i64: 32, 32>}, {pipeline_mode = #tpu.pipeline_mode<synchronous>, transform_indices = @transform_5, window_bounds = array<i64: 64, 256>}, {pipeline_mode = #tpu.pipeline_mode<synchronous>, transform_indices = @transform_6, window_bounds = array<i64: 256, 8>}, {pipeline_mode = #tpu.pipeline_mode<synchronous>, transform_indices = @transform_7, window_bounds = array<i64: 8, 256>}, {pipeline_mode = #tpu.pipeline_mode<synchronous>, transform_indices = @transform_8, window_bounds = array<i64: 32, 256>}, {transform_indices = @transform_9, window_bounds = array<i64: 8, 256>}, {transform_indices = @transform_10, window_bounds = array<i64: 8, 8>}]} {
    %c0 = arith.constant 0 : index
    %c0_0 = arith.constant 0 : index
    %0 = vector.load %arg1[%c0, %c0_0] : memref<8x32xf32, #tpu.memory_space<vmem>>, vector<8x32xf32>
    %c0_1 = arith.constant 0 : index
    %c0_2 = arith.constant 0 : index
    %1 = vector.load %arg2[%c0_1, %c0_2] : memref<8x32xf32, #tpu.memory_space<vmem>>, vector<8x32xf32>
    %c0_3 = arith.constant 0 : index
    %c0_4 = arith.constant 0 : index
    %2 = vector.load %arg3[%c0_3, %c0_4] : memref<8x256xf32, #tpu.memory_space<vmem>>, vector<8x256xf32>
    %c0_5 = arith.constant 0 : index
    %c0_6 = arith.constant 0 : index
    %3 = vector.load %arg4[%c0_5, %c0_6] : memref<32x64xf32, #tpu.memory_space<vmem>>, vector<32x64xf32>
    %cst = arith.constant dense<0.000000e+00> : vector<8x64xf32>
    %4 = tpu.matmul %1, %3, %cst {dimension_numbers = #tpu.dot_dimension_numbers<[1], [0], [0], [1], [0, 0, 1, 1], [], []>} : vector<8x32xf32>, vector<32x64xf32>, vector<8x64xf32> -> vector<8x64xf32>
    %c0_7 = arith.constant 0 : index
    %c0_8 = arith.constant 0 : index
    %5 = vector.load %arg5[%c0_7, %c0_8] : memref<32x32xf32, #tpu.memory_space<vmem>>, vector<32x32xf32>
    %cst_9 = arith.constant dense<0.000000e+00> : vector<8x32xf32>
    %6 = tpu.matmul %0, %5, %cst_9 {dimension_numbers = #tpu.dot_dimension_numbers<[1], [0], [0], [1], [0, 0, 1, 1], [], []>} : vector<8x32xf32>, vector<32x32xf32>, vector<8x32xf32> -> vector<8x32xf32>
    %c0_10 = arith.constant 0 : index
    %c0_11 = arith.constant 0 : index
    %7 = vector.load %arg5[%c0_10, %c0_11] : memref<32x32xf32, #tpu.memory_space<vmem>>, vector<32x32xf32>
    %cst_12 = arith.constant dense<0.000000e+00> : vector<8x32xf32>
    %8 = tpu.matmul %1, %7, %cst_12 {dimension_numbers = #tpu.dot_dimension_numbers<[1], [0], [0], [1], [0, 0, 1, 1], [], []>} : vector<8x32xf32>, vector<32x32xf32>, vector<8x32xf32> -> vector<8x32xf32>
    %c0_13 = arith.constant 0 : index
    %c0_14 = arith.constant 0 : index
    %9 = vector.load %arg6[%c0_13, %c0_14] : memref<64x256xf32, #tpu.memory_space<vmem>>, vector<64x256xf32>
    %cst_15 = arith.constant dense<0.000000e+00> : vector<8x256xf32>
    %10 = tpu.matmul %4, %9, %cst_15 {dimension_numbers = #tpu.dot_dimension_numbers<[1], [0], [0], [1], [0, 0, 1, 1], [], []>} : vector<8x64xf32>, vector<64x256xf32>, vector<8x256xf32> -> vector<8x256xf32>
    %11 = arith.mulf %2, %10 : vector<8x256xf32>
    %c0_16 = arith.constant 0 : index
    %c0_17 = arith.constant 0 : index
    %12 = vector.load %arg7[%c0_16, %c0_17] : memref<256x8xf32, #tpu.memory_space<vmem>>, vector<256x8xf32>
    %cst_18 = arith.constant dense<0.000000e+00> : vector<8x8xf32>
    %13 = tpu.matmul %11, %12, %cst_18 {dimension_numbers = #tpu.dot_dimension_numbers<[1], [0], [0], [1], [0, 0, 1, 1], [], []>} : vector<8x256xf32>, vector<256x8xf32>, vector<8x8xf32> -> vector<8x8xf32>
    %cst_19 = arith.constant 6.250000e-02 : f32
    %14 = vector.broadcast %cst_19 : f32 to vector<8x8xf32>
    %15 = arith.mulf %14, %13 : vector<8x8xf32>
    %cst_20 = arith.constant 0.000000e+00 : f32
    %16 = vector.broadcast %cst_20 : f32 to vector<8x8xf32>
    %17 = arith.subf %16, %15 : vector<8x8xf32>
    %18 = math.exp %17 : vector<8x8xf32>
    %cst_21 = arith.constant 1.000000e+00 : f32
    %19 = vector.broadcast %cst_21 : f32 to vector<8x8xf32>
    %20 = arith.addf %19, %18 : vector<8x8xf32>
    %cst_22 = arith.constant 1.000000e+00 : f32
    %21 = vector.broadcast %cst_22 : f32 to vector<8x8xf32>
    %22 = arith.divf %21, %20 : vector<8x8xf32>
    %c0_23 = arith.constant 0 : index
    %c0_24 = arith.constant 0 : index
    %23 = vector.load %arg8[%c0_23, %c0_24] : memref<8x256xf32, #tpu.memory_space<vmem>>, vector<8x256xf32>
    %cst_25 = arith.constant dense<0.000000e+00> : vector<8x256xf32>
    %24 = tpu.matmul %22, %23, %cst_25 {dimension_numbers = #tpu.dot_dimension_numbers<[1], [0], [0], [1], [0, 0, 1, 1], [], []>} : vector<8x8xf32>, vector<8x256xf32>, vector<8x256xf32> -> vector<8x256xf32>
    %c0_26 = arith.constant 0 : index
    %c0_27 = arith.constant 0 : index
    %25 = vector.load %arg9[%c0_26, %c0_27] : memref<32x256xf32, #tpu.memory_space<vmem>>, vector<32x256xf32>
    %cst_28 = arith.constant dense<0.000000e+00> : vector<8x256xf32>
    %26 = tpu.matmul %6, %25, %cst_28 {dimension_numbers = #tpu.dot_dimension_numbers<[1], [0], [0], [1], [0, 0, 1, 1], [], []>} : vector<8x32xf32>, vector<32x256xf32>, vector<8x256xf32> -> vector<8x256xf32>
    %c0_29 = arith.constant 0 : index
    %c0_30 = arith.constant 0 : index
    %27 = vector.load %arg9[%c0_29, %c0_30] : memref<32x256xf32, #tpu.memory_space<vmem>>, vector<32x256xf32>
    %cst_31 = arith.constant dense<0.000000e+00> : vector<8x256xf32>
    %28 = tpu.matmul %8, %27, %cst_31 {dimension_numbers = #tpu.dot_dimension_numbers<[1], [0], [0], [1], [0, 0, 1, 1], [], []>} : vector<8x32xf32>, vector<32x256xf32>, vector<8x256xf32> -> vector<8x256xf32>
    %29 = arith.mulf %24, %28 : vector<8x256xf32>
    %30 = arith.addf %26, %29 : vector<8x256xf32>
    %c0_32 = arith.constant 0 : index
    %c0_33 = arith.constant 0 : index
    %31 = vector.load %arg10[%c0_32, %c0_33] : memref<8x256xf32, #tpu.memory_space<vmem>>, vector<8x256xf32>
    tpu.vector_store %arg10[%c0_32, %c0_33], %30 {strides = array<i32>} : memref<8x256xf32, #tpu.memory_space<vmem>>, vector<8x256xf32>,
    %c0_34 = arith.constant 0 : index
    %c0_35 = arith.constant 0 : index
    %32 = vector.load %arg11[%c0_34, %c0_35] : memref<8x8xf32, #tpu.memory_space<vmem>>, vector<8x8xf32>
    tpu.vector_store %arg11[%c0_34, %c0_35], %22 {strides = array<i32>} : memref<8x8xf32, #tpu.memory_space<vmem>>, vector<8x8xf32>,
    return
  }
  func.func @transform_0(%arg0: i32) -> (i32, i32) {
    %c0_i32 = arith.constant 0 : i32
    %c0_i32_0 = arith.constant 0 : i32
    return %arg0, %c0_i32 : i32, i32
  }
  func.func @transform_1(%arg0: i32) -> (i32, i32) {
    %c0_i32 = arith.constant 0 : i32
    %c0_i32_0 = arith.constant 0 : i32
    return %arg0, %c0_i32 : i32, i32
  }
  func.func @transform_2(%arg0: i32) -> (i32, i32) {
    %c0_i32 = arith.constant 0 : i32
    %c0_i32_0 = arith.constant 0 : i32
    return %arg0, %c0_i32 : i32, i32
  }
  func.func @transform_3(%arg0: i32) -> (i32, i32) {
    %c0_i32 = arith.constant 0 : i32
    %c0_i32_0 = arith.constant 0 : i32
    %c0_i32_1 = arith.constant 0 : i32
    return %c0_i32, %c0_i32_0 : i32, i32
  }
  func.func @transform_4(%arg0: i32) -> (i32, i32) {
    %c0_i32 = arith.constant 0 : i32
    %c0_i32_0 = arith.constant 0 : i32
    %c0_i32_1 = arith.constant 0 : i32
    return %c0_i32, %c0_i32_0 : i32, i32
  }
  func.func @transform_5(%arg0: i32) -> (i32, i32) {
    %c0_i32 = arith.constant 0 : i32
    %c0_i32_0 = arith.constant 0 : i32
    %c0_i32_1 = arith.constant 0 : i32
    return %c0_i32, %c0_i32_0 : i32, i32
  }
  func.func @transform_6(%arg0: i32) -> (i32, i32) {
    %c0_i32 = arith.constant 0 : i32
    %c0_i32_0 = arith.constant 0 : i32
    %c0_i32_1 = arith.constant 0 : i32
    return %c0_i32, %c0_i32_0 : i32, i32
  }
  func.func @transform_7(%arg0: i32) -> (i32, i32) {
    %c0_i32 = arith.constant 0 : i32
    %c0_i32_0 = arith.constant 0 : i32
    %c0_i32_1 = arith.constant 0 : i32
    return %c0_i32, %c0_i32_0 : i32, i32
  }
  func.func @transform_8(%arg0: i32) -> (i32, i32) {
    %c0_i32 = arith.constant 0 : i32
    %c0_i32_0 = arith.constant 0 : i32
    %c0_i32_1 = arith.constant 0 : i32
    return %c0_i32, %c0_i32_0 : i32, i32
  }
  func.func @transform_9(%arg0: i32) -> (i32, i32) {
    %c0_i32 = arith.constant 0 : i32
    %c0_i32_0 = arith.constant 0 : i32
    return %arg0, %c0_i32 : i32, i32
  }
  func.func @transform_10(%arg0: i32) -> (i32, i32) {
    %c0_i32 = arith.constant 0 : i32
    %c0_i32_0 = arith.constant 0 : i32
    return %arg0, %c0_i32 : i32, i32
  }
}

</mosaic_0001>

<bundles_post_ra>
// kernel: tpu_custom_call.1
= control target key start
LH: loop header
LB: loop body
LE: loop exit
PB: predicated region body
PF: predicated region fallthrough
CT: control target
= control target key end

     0   :  { %s2221_s0 = inlined_call_operand.vmem [shape: f32[16,32], index: 0, kind: input, shape index: {}]   ;;  %s2222_s1 = inlined_call_operand.hbm [shape: f32[16,32], index: 1, kind: input, shape index: {}]   ;;  %s2223_s2 = inlined_call_operand.vmem [shape: f32[16,256], index: 2, kind: input, shape index: {}]   ;;  %s2224_s3 = inlined_call_operand.vmem [shape: f32[32,64], index: 3, kind: input, shape index: {}]   ;;  %s2225_s4 = inlined_call_operand.hbm [shape: f32[32,32], index: 4, kind: input, shape index: {}]   ;;  %s2226_s5 = inlined_call_operand.vmem [shape: f32[64,256], index: 5, kind: input, shape index: {}]   ;;  %s2227_s6 = inlined_call_operand.vmem [shape: f32[256,8], index: 6, kind: input, shape index: {}]   ;;  %s2228_s7 = inlined_call_operand.hbm [shape: f32[8,256], index: 7, kind: input, shape index: {}]   ;;  %s2229_s8 = inlined_call_operand.vmem [shape: f32[32,256], index: 8, kind: input, shape index: {}]   ;;  %s2230_s9 = inlined_call_operand.hbm [shape: f32[16,256], index: 9, kind: output, shape index: {0}]   ;;  %s2231_s10 = inlined_call_operand.vmem [shape: f32[16,8], index: 10, kind: output, shape index: {1}]  }
   0x1   :  { %2237 = sst [smem:[#allocation14_spill]] %s2222_s1 }
   0x2   :  { %2238 = sst [smem:[#allocation15_spill]] %s2224_s3 }
   0x3   :  { %16 = vsyncpa [#allocation3], 0 }
   0x4   :  { %18 = vsyncpa [#allocation3 + $0x1], 0 }
   0x5   :  { %19 = vsyncpa [#allocation6], 0 }
   0x6   :  { %20 = vsyncpa [#allocation4], 0 }
   0x7   :  { %22 = vsyncpa [#allocation4 + $0x1], 0  ;;  %s1771_s13 = smov 0   ;;  %s1773_s14 = smov 0  }
   0x8   :  { %s1775_s15 = smov 0   ;;  %s1777_s16 = smov 0  }
   0x9 LB: > { %2239 = sst [smem:[#allocation12_spill]] %s1693_s13  ;;  %s1792_s17 = sadd.s32 4294967295, %s1705_s16   ;;  %s1705_s16 = sphi %s1777_s16, %s2261_s16   ;;  %s1701_s15 = sphi %s1775_s15, %s2260_s15   ;;  %s1697_s14 = sphi %s1773_s14, %s2259_s14   ;;  %s1693_s13 = sphi %s1771_s13, %s2258_s13  }
   0xa   : > { %s1278_s18 = sadd.s32 4294967294, %s1705_s16   ;;  %p74_p0 = scmp.ne.s32.totalorder %s1697_s14, %s1693_s13 }
   0xb   : > { %p2232_p1 = scmp.eq.s32.totalorder %s1792_s17, 0  ;;  %p256_p3 = scmp.eq.s32.totalorder %s1278_s18, 1 }
   0xc   : > { %p1279_p5 = scmp.ge.s32.totalorder %s1705_s16, 1  ;;  %p289_p7 = scmp.lt.s32.totalorder %s1705_s16, 3 }
   0xd   : > { %p1801_p4 = por %p2232_p1, %p74_p0  ;;  %p1806_p6 = por %p256_p3, %p74_p0 }
   0xe   : > { %p1811_p8 = pnand %p1279_p5, %p289_p7  ;;  %s1707_s22 = smov [#allocation5]  }
   0xf   : > { %s2240_s19 = scalar_select %p1801_p4, 1, 0 }
  0x10   : > { %s2241_s20 = scalar_select %p1806_p6, 1, 0 }
  0x11   : > { %s304_s23 = sshll.u32 %s1707_s22, 4  ;;  %p1485_p9 = pneg %p1811_p8  ;;  %s1815_s23 = int_to_ptr.vmem [resolvable:$true] %s304_s23 }
  0x12   : > { %2242 = sst [smem:[#allocation13_spill]] %s2241_s20  ;;  %s1708_s25 = smov [#allocation7]  }
  0x13   : > { %p1822_p11 = pnand %p1485_p9, %p2232_p1  ;;  %s324_s26 = sshll.u32 %s1708_s25, 4  ;;  %s1826_s26 = int_to_ptr.vmem [resolvable:$true] %s324_s26 }
  0x14   : > { %s1549_s29 = scalar_lea.hbm %s2225_s4, 512 }
  0x15   : > { %p1550_p12 = scmp.ne.s32.totalorder %s2225_s4, %s1549_s29  ;;  %p1551_p13 = pneg %p1822_p11 }
  0x16   : > { %p1556_p5 = scmp.lt.u32.totalorder %s1549_s29, %s2225_s4 }
  0x17   : > { %p1552_p0 = pnand %p1551_p13, %p1550_p12 }
  0x19   : > { %p1553_p3 = pneg %p1552_p0 }
  0x1b   : > { %p1558_p7 = pnand %p1556_p5, %p1553_p3 }
  0x1d   : > { %1561 = shalt.err (!%p1558_p7)
}
  0x1e   : > { %s1562_s22 = scalar_lea.vmem %s1815_s23, 512  ;;  %p1570_p2 = scmp.lt.s32.totalorder %s1815_s23, %s1815_s23 }
  0x1f   : > { %p1563_p9 = scmp.ne.s32.totalorder %s1815_s23, %s1562_s22  ;;  %p1571_p12 = scmp.lt.s32.totalorder %s1562_s22, %s1562_s22 }
  0x21   : > { %p1565_p10 = pnand %p1563_p9, %p1551_p13  ;;  %p1572_p0 = por %p1571_p12, %p1570_p2 }
  0x23   : > { %p1566_p1 = pneg %p1565_p10 }
  0x25   : > { %p1573_p6 = pnand %p1572_p0, %p1566_p1 }
  0x27   : > { %1576 = shalt.err (!%p1573_p6)
}
  0x28   : > { %s1709_s25 = smov 128   ;;  %s1710_s27 = smov 8  }
  0x29   : > { %1488 = dma.hbm_to_vmem [thread:$0]  (!%p1822_p11), %s2225_s4, 512, %s1815_s23, [#allocation6], %s1709_s25, %s1709_s25, %s1710_s27  }
  0x2a   : > { %s1577_s12 = scalar_lea.hbm %s2228_s7, 256 }
  0x2b   : > { %p1578_p2 = scmp.ne.s32.totalorder %s2228_s7, %s1577_s12  ;;  %p1584_p10 = scmp.lt.u32.totalorder %s1577_s12, %s2228_s7 }
  0x2d   : > { %p1580_p1 = pnand %p1578_p2, %p1551_p13 }
  0x2f   : > { %p1581_p6 = pneg %p1580_p1 }
  0x31   : > { %p1586_p3 = pnand %p1584_p10, %p1581_p6 }
  0x33   : > { %1589 = shalt.err (!%p1586_p3)
}
  0x34   : > { %s1590_s23 = scalar_lea.vmem %s1826_s26, 256  ;;  %p1598_p12 = scmp.lt.s32.totalorder %s1826_s26, %s1826_s26 }
  0x35   : > { %p1591_p5 = scmp.ne.s32.totalorder %s1826_s26, %s1590_s23  ;;  %p1599_p0 = scmp.lt.s32.totalorder %s1590_s23, %s1590_s23 }
  0x37   : > { %p1593_p7 = pnand %p1591_p5, %p1551_p13  ;;  %p1600_p2 = por %p1599_p0, %p1598_p12 }
  0x39   : > { %p1594_p9 = pneg %p1593_p7 }
  0x3b   : > { %p1601_p1 = pnand %p1600_p2, %p1594_p9 }
  0x3d   : > { %1604 = shalt.err (!%p1601_p1)
}
  0x3e   : > { %1491 = dma.hbm_to_vmem [thread:$0]  (!%p1822_p11), %s2228_s7, 256, %s1826_s26, [#allocation6]  }
  0x3f   : > { %s1881_s25 = sadd.s32 1, %s1705_s16   ;;  %s61_s24 = sadd.s32 1, %s1701_s15 }
  0x40   : > { %s58_s27 = ssub.s32 %s1705_s16, %s1881_s25  ;;  %p68_p13 = scmp.ne.s32.totalorder %s1701_s15, %s1697_s14 }
  0x41   : > { %p59_p6 = scmp.eq.s32.totalorder %s58_s27, 0  ;;  %p69_p10 = scmp.eq.s32.totalorder %s1705_s16, 0 }
  0x42   : > { %p2245_p3 = scmp.eq.s32.totalorder %s1792_s17, 1  ;;  %p1502_p7 = scmp.lt.s32.totalorder %s1705_s16, 2 }
  0x43   : > { %s1897_s29 = scalar_select %p59_p6, %s1701_s15, %s61_s24  }
  0x44   : > { %p1891_p5 = por %p2245_p3, %p68_p13  ;;  %p70_p9 = por %p69_p10, %p68_p13 }
  0x45   : > { %s345_s30 = sand.u32 1, %s1701_s15   ;;  %s1284_s26 = sshll.u32 %s1705_s16, 7 }
  0x46   : > { %s2246_s28 = scalar_select %p1891_p5, 1, 0 }
  0x47   : > { %s1283_s11 = sshll.u32 %s345_s30, 3  ;;  %s2247_s1 = sld [smem:[#allocation14_spill]] }
  0x48   : > { %s349_s23 = scalar_lea.vmem [#allocation2], %s1283_s11  ;;  %p1908_p11 = pnand %p1502_p7, %p70_p9 }
  0x49   : > { %s356_s13 = sshll.u32 %s349_s23, 4  ;;  %s346_s24 = scalar_lea.sflag [#allocation3], %s345_s30  ;;  %s1906_s13 = int_to_ptr.vmem [resolvable:$true] %s356_s13 }
  0x4a   : > { %p1607_p0 = pneg %p1908_p11 }
  0x4d   : > { %s1904_s22 = scalar_lea.hbm %s2247_s1, %s1284_s26  ;;  %s1610_s12 = scalar_lea.hbm %s2247_s1, 256 }
  0x4e   : > { %s1605_s27 = scalar_lea.hbm %s1904_s22, 128  ;;  %p1611_p13 = scmp.lt.u32.totalorder %s1904_s22, %s2247_s1 }
  0x4f   : > { %p1606_p12 = scmp.ne.s32.totalorder %s1904_s22, %s1605_s27  ;;  %p1612_p6 = scmp.lt.u32.totalorder %s1610_s12, %s1605_s27 }
  0x50   : > { %p1614_p3 = scmp.lt.u32.totalorder %s1605_s27, %s1904_s22 }
  0x51   : > { %p1608_p2 = pnand %p1607_p0, %p1606_p12  ;;  %p1613_p10 = por %p1612_p6, %p1611_p13 }
  0x53   : > { %p1609_p1 = pneg %p1608_p2  ;;  %p1615_p7 = por %p1614_p3, %p1613_p10 }
  0x55   : > { %p1616_p9 = pnand %p1615_p7, %p1609_p1 }
  0x57   : > { %1619 = shalt.err (!%p1616_p9)
}
  0x58   : > { %s1620_s30 = scalar_lea.vmem %s1906_s13, 128  ;;  %s1711_s26 = smov [#allocation2]  }
  0x59   : > { %p1621_p12 = scmp.ne.s32.totalorder %s1906_s13, %s1620_s30  ;;  %s1625_s11 = sshll.u32 %s1711_s26, 4  ;;  %s1626_s11 = int_to_ptr.vmem [resolvable:$false] %s1625_s11 }
  0x5a   : > { %s1627_s18 = scalar_lea.vmem %s1626_s11, 256  ;;  %p1628_p4 = scmp.lt.s32.totalorder %s1906_s13, %s1626_s11 }
  0x5b   : > { %p1623_p2 = pnand %p1621_p12, %p1607_p0  ;;  %p1629_p13 = scmp.lt.s32.totalorder %s1627_s18, %s1620_s30 }
  0x5d   : > { %p1624_p5 = pneg %p1623_p2  ;;  %p1630_p6 = por %p1629_p13, %p1628_p4 }
  0x5f   : > { %p1631_p10 = pnand %p1630_p6, %p1624_p5 }
  0x61   : > { %1634 = shalt.err (!%p1631_p10)
}
  0x62   : > { %1495 = dma.hbm_to_vmem [thread:$0]  (!%p1908_p11), %s1904_s22, 128, %s1906_s13, %s346_s24  }
  0x63   : > { %373 = sbr.rel (%p1811_p8) target bundleno = 1044 (0x414), region = 56  ;;  %s1940_s27 = sand.u32 (!%p1811_p8), 1, %s1697_s14  }
  0x64   : > { %s1286_s12 = sshll.u32 (!%p1811_p8), %s1940_s27, 3  ;;  %s376_s23 = scalar_lea.sflag (!%p1811_p8), [#allocation3], %s1940_s27 }
  0x65   : > { %s1944_s30 = scalar_lea.vmem (!%p1811_p8), [#allocation2], %s1286_s12  ;;  %p2249_p4 = scmp.ne.s32.totalorder (!%p1811_p8), %s2240_s19, 0 }
  0x6a   : > { %1680 = dma.done.wait (%p2249_p4), %s376_s23, 128  }
  0x6b   : > { %1682 = vsyncadd (%p2249_p4), %s376_s23, 4294967168  ;;  %p2250_p5 = scmp.eq.s32.totalorder %s1792_s17, 0 }
  0x6d   : > { %1684 = dma.done.wait (%p2250_p5), [#allocation6], 768   ;;  %p2251_p8 = pmov %p2250_p5 }
  0x6e   : > { %v1712_v0 = vmov 0.0|0.0   ;;  %vm1713_vm0 = vmmov 0   ;;  %v1714_v1 = vmov 0.0   ;;  %p437_p11 = scmp.lt.s32.totalorder %s1792_s17, 1  ;;  %s2252_s3 = sld [smem:[#allocation15_spill]]  ;;  %v532_v7 = vld [vmem:[#allocation5] sm:$0xff] }
  0x6f   : > { %1686 = vsyncadd (%p2251_p8), [#allocation6], 4294966528  ;;  %1391 = vmatprep.subr.bf16.mxu0 %v1712_v0  ;;  %1366 = vmatprep.mubr.msk.f32.mxu0 %vm1713_vm0, %v1714_v1  ;;  %v533_v8 = vld [vmem:[#allocation5 + $0x8] sm:$0xff]  ;;  %v534_v9 = vld [vmem:[#allocation5 + $0x10] sm:$0xff]  ;;  %vm458_vm1 = vcmask 261120   ;;  %vm695_vm2 = vcmask 523264  }
  0x70   : > { %1397 = vmatprep.subr.bf16.mxu1 %v1712_v0  ;;  %1377 = vmatprep.mubr.msk.f32.mxu1 %vm1713_vm0, %v1714_v1  ;;  %s1960_s19 = scalar_select %p437_p11, %s1792_s17, 1  ;;  %v535_v10 = vld [vmem:[#allocation5 + $0x18] sm:$0xff]  ;;  %v1398_v12 = vpack.c.bf16 %v533_v8, %v532_v7  ;;  %v682_v14 = vld [vmem:[%s2226_s5 + $0x18] sm:$0xff]  ;;  %v679_v17 = vld [vmem:[%s2226_s5] sm:$0xff]  ;;  %vm883_vm3 = vcmask 64512  }
  0x71   : > { %v680_v13 = vld [vmem:[%s2226_s5 + $0x8] sm:$0xff]  ;;  %v1401_v15 = vpack.c.bf16 %v535_v10, %v534_v9  ;;  %v681_v18 = vld [vmem:[%s2226_s5 + $0x10] sm:$0xff]  ;;  %v686_v21 = vld [vmem:[%s2226_s5 + $0x38] sm:$0xff]  ;;  %s1120_s18 = scalar_lea.sflag [#allocation4], %s1940_s27  ;;  %p2253_p1 = scmp.ne.s32.totalorder %s2246_s28, 0 }
  0x72   : > { %s1290_s12 = sshll.u32 %s1960_s19, 3  ;;  %1399 = vmatpush3.bf16.msra.mxu1 %v1398_v12  ;;  %v1409_v16 = vpack.c.bf16 %v682_v14, %v680_v13  ;;  %v451_v19 = vld [vmem:[%s1944_s30] sm:$0xff]  ;;  %v1411_v23 = vpack.c.bf16 %v681_v18, %v679_v17  ;;  %v685_v26 = vld [vmem:[%s2226_s5 + $0x30] sm:$0xff]  ;;  %v690_v28 = vld [vmem:[%s2226_s5 + $0x58] sm:$0xff]  ;;  %s1306_s20 = sshll.u32 %s1960_s19, 4 }
  0x73   : > { %1400 = vmatprep.subr.bf16.mxu1 %v1712_v0  ;;  %s440_s26 = scalar_lea.vmem %s2221_s0, %s1290_s12  ;;  %v684_v20 = vld [vmem:[%s2226_s5 + $0x28] sm:$0xff]  ;;  %v683_v25 = vld [vmem:[%s2226_s5 + $0x20] sm:$0xff]  ;;  %v689_v32 = vld [vmem:[%s2226_s5 + $0x50] sm:$0xff]  ;;  %s445_s11 = scalar_lea.vmem %s2223_s2, %s1306_s20 }
  0x74   : > { %v454_v2 = vld [vmem:[%s2252_s3] sm:$0xff]  ;;  %v455_v3 = vld [vmem:[%s2252_s3 + $0x8] sm:$0xff]  ;;  %v456_v4 = vld [vmem:[%s2252_s3 + $0x10] sm:$0xff]  ;;  %v1413_v24 = vpack.c.bf16 %v686_v21, %v684_v20  ;;  %v1415_v29 = vpack.c.bf16 %v685_v26, %v683_v25  ;;  %s449_s1 = scalar_lea.vmem %s2231_s10, %s1290_s12  ;;  %s1289_s19 = sshll.u32 %s1940_s27, 4 }
  0x75   : > { %v1392_v5 = vpack.c.bf16 %v455_v3, %v454_v2  ;;  %v457_v6 = vld [vmem:[%s2252_s3 + $0x18] sm:$0xff]  ;;  %v450_v22 = vld [vmem:[%s440_s26] sm:$0xff]  ;;  %v688_v27 = vld [vmem:[%s2226_s5 + $0x48] sm:$0xff]  ;;  %s1307_s12 = sshll.u32 %s1792_s17, 8  ;;  %s430_s13 = scalar_lea.vmem [#allocation8], %s1289_s19 }
  0x76   : > { %v1395_v11 = vpack.c.bf16 %v457_v6, %v456_v4  ;;  %1402 = vmatpush3.bf16.msra.mxu1 %v1401_v15  ;;  %v1417_v30 = vpack.c.bf16 %v690_v28, %v688_v27  ;;  %v687_v31 = vld [vmem:[%s2226_s5 + $0x40] sm:$0xff]  ;;  %v692_v33 = vld [vmem:[%s2226_s5 + $0x68] sm:$0xff]  ;;  %v694_v34 = vld [vmem:[%s2226_s5 + $0x78] sm:$0xff]  ;;  %s1138_s20 = sshll.u32 %s430_s13, 4  ;;  %s1715_s23 = smov [#allocation8]   ;;  %s2179_s20 = int_to_ptr.vmem [resolvable:$true] %s1138_s20 }
  0x77   : > { %1393 = vmatpush3.bf16.msra.mxu0 %v1392_v5  ;;  %1410 = vmatprep.subr.bf16.mxu1 %v1409_v16  ;;  %v1419_v35 = vpack.c.bf16 %v689_v32, %v687_v31  ;;  %v1421_v36 = vpack.c.bf16 %v694_v34, %v692_v33  ;;  %v691_v37 = vld [vmem:[%s2226_s5 + $0x60] sm:$0xff]  ;;  %v693_v38 = vld [vmem:[%s2226_s5 + $0x70] sm:$0xff]  ;;  %v789_v41 = vld [vmem:[%s2227_s6 + $0x88] sm:$0xff]  ;;  %s1635_s17 = scalar_lea.vmem %s2179_s20, 256 }
  0x78   : > { %1394 = vmatprep.subr.bf16.mxu0 %v1712_v0  ;;  %v1423_v39 = vpack.c.bf16 %v693_v38, %v691_v37  ;;  %v788_v40 = vld [vmem:[%s2227_s6 + $0x80] sm:$0xff]  ;;  %v773_v44 = vld [vmem:[%s2227_s6 + $0x8] sm:$0xff]  ;;  %v790_v45 = vld [vmem:[%s2227_s6 + $0x90] sm:$0xff]  ;;  %p1636_p0 = scmp.ne.s32.totalorder %s2179_s20, %s1635_s17 }
  0x79   : > { %1378 = vmatmul.mubr.msk.f32.vlgmr.msra.gmra.mrb[0].mxu1 %vm458_vm1, %v450_v22  ;;  %v772_v42 = vld [vmem:[%s2227_s6] sm:$0xff]  ;;  %v1425_v43 = vpack.c.bf16 %v789_v41, %v788_v40  ;;  %v791_v46 = vld [vmem:[%s2227_s6 + $0x98] sm:$0xff]  ;;  %v774_v49 = vld [vmem:[%s2227_s6 + $0x10] sm:$0xff] }
  0x7a   : > { %1412 = vmatpush1.bf16.msra.mxu1 %v1411_v23  ;;  %763 = vmatprep.mubr.f32.mxu1 %v1714_v1  ;;  %v1427_v47 = vpack.c.bf16 %v773_v44, %v772_v42  ;;  %v1429_v48 = vpack.c.bf16 %v791_v46, %v790_v45  ;;  %v775_v50 = vld [vmem:[%s2227_s6 + $0x18] sm:$0xff]  ;;  %v792_v51 = vld [vmem:[%s2227_s6 + $0xa0] sm:$0xff]  ;;  %v793_v52 = vld [vmem:[%s2227_s6 + $0xa8] sm:$0xff]  ;;  %p1637_p3 = pnand %p1636_p0, %p2253_p1 }
  0x7b   : > { %1396 = vmatpush3.bf16.msra.mxu0 %v1395_v11  ;;  %1414 = vmatprep.subr.bf16.mxu1 %v1413_v24  ;;  %v1431_v53 = vpack.c.bf16 %v775_v50, %v774_v49  ;;  %v1433_v54 = vpack.c.bf16 %v793_v52, %v792_v51  ;;  %v776_v55 = vld [vmem:[%s2227_s6 + $0x20] sm:$0xff]  ;;  %v777_v56 = vld [vmem:[%s2227_s6 + $0x28] sm:$0xff]  ;;  %v794_v57 = vld [vmem:[%s2227_s6 + $0xb0] sm:$0xff] }
  0x7c   : > { %1403 = vmatprep.subr.bf16.mxu0 %v1712_v0  ;;  %v795_v58 = vld [vmem:[%s2227_s6 + $0xb8] sm:$0xff]  ;;  %v1435_v59 = vpack.c.bf16 %v777_v56, %v776_v55  ;;  %v778_v61 = vld [vmem:[%s2227_s6 + $0x30] sm:$0xff]  ;;  %v796_v63 = vld [vmem:[%s2227_s6 + $0xc0] sm:$0xff]  ;;  %p1638_p7 = pneg %p1637_p3 }
  0x7d   : > { %v1437_v60 = vpack.c.bf16 %v795_v58, %v794_v57  ;;  %v779_v62 = vld [vmem:[%s2227_s6 + $0x38] sm:$0xff]  ;;  %v780_v4 = vld [vmem:[%s2227_s6 + $0x40] sm:$0xff]  ;;  %v781_v5 = vld [vmem:[%s2227_s6 + $0x48] sm:$0xff] }
  0x7e   : > { %1367 = vmatmul.mubr.msk.f32.vlgmr.msra.gmra.mrb[0].mxu0 %vm458_vm1, %v451_v19  ;;  %1416 = vmatpush1.bf16.msra.mxu1 %v1415_v29  ;;  %v1439_v2 = vpack.c.bf16 %v779_v62, %v778_v61  ;;  %v798_v6 = vld [vmem:[%s2227_s6 + $0xd0] sm:$0xff]  ;;  %v799_v7 = vld [vmem:[%s2227_s6 + $0xd8] sm:$0xff]  ;;  %v1443_v8 = vpack.c.bf16 %v781_v5, %v780_v4  ;;  %v801_v13 = vld [vmem:[%s2227_s6 + $0xe8] sm:$0xff] }
  0x7f   : > { %1405 = vmatpush3.bf16.msra.mxu0 %v1398_v12  ;;  %1388 = vmatprep.mubr.msk.f32.mxu0 %vm1713_vm0, %v1714_v1  ;;  %v1445_v9 = vpack.c.bf16 %v799_v7, %v798_v6  ;;  %v782_v10 = vld [vmem:[%s2227_s6 + $0x50] sm:$0xff]  ;;  %v783_v11 = vld [vmem:[%s2227_s6 + $0x58] sm:$0xff]  ;;  %v800_v12 = vld [vmem:[%s2227_s6 + $0xe0] sm:$0xff] }
  0x80   : > { %1406 = vmatprep.subr.bf16.mxu0 %v1712_v0  ;;  %1418 = vmatprep.subr.bf16.mxu1 %v1417_v30  ;;  %v797_v0 = vld [vmem:[%s2227_s6 + $0xc8] sm:$0xff]  ;;  %v1447_v14 = vpack.c.bf16 %v783_v11, %v782_v10  ;;  %v784_v16 = vld [vmem:[%s2227_s6 + $0x60] sm:$0xff]  ;;  %v802_v23 = vld [vmem:[%s2227_s6 + $0xf0] sm:$0xff] }
  0x81   : > { %v1441_v3 = vpack.c.bf16 %v797_v0, %v796_v63  ;;  %v785_v17 = vld [vmem:[%s2227_s6 + $0x68] sm:$0xff]  ;;  %v803_v24 = vld [vmem:[%s2227_s6 + $0xf8] sm:$0xff]  ;;  %v786_v26 = vld [vmem:[%s2227_s6 + $0x70] sm:$0xff] }
  0x82   : > { %1420 = vmatpush1.bf16.msra.mxu1 %v1419_v35  ;;  %v1451_v18 = vpack.c.bf16 %v785_v17, %v784_v16  ;;  %v1453_v25 = vpack.c.bf16 %v803_v24, %v802_v23  ;;  %v787_v27 = vld [vmem:[%s2227_s6 + $0x78] sm:$0xff]  ;;  %v453_v31 = vld [vmem:[%s445_s11 + $0x8] sm:$0xff]  ;;  %v452_v32 = vld [vmem:[%s445_s11] sm:$0xff]  ;;  %s2177_s11 = scalar_lea.hbm %s2230_s9, %s1307_s12 }
  0x83   : > { %1408 = vmatpush3.bf16.msra.mxu0 %v1401_v15  ;;  %1422 = vmatprep.subr.bf16.mxu1 %v1421_v36  ;;  %v1449_v15 = vpack.c.bf16 %v801_v13, %v800_v12  ;;  %v1455_v28 = vpack.c.bf16 %v787_v27, %v786_v26  ;;  %v882_v37 = vld [vmem:[#allocation7 + $0x8] sm:$0xff]  ;;  %v881_v38 = vld [vmem:[#allocation7] sm:$0xff]  ;;  %v958_v50 = vld [vmem:[%s2229_s8] sm:$0xff] }
  0x84   : > { %1426 = vmatprep.subr.bf16.mxu0 %v1425_v43  ;;  %v961_v40 = vld [vmem:[%s2229_s8 + $0x18] sm:$0xff]  ;;  %v960_v51 = vld [vmem:[%s2229_s8 + $0x10] sm:$0xff]  ;;  %v963_v52 = vld [vmem:[%s2229_s8 + $0x28] sm:$0xff] }
  0x85   : > { %v962_v56 = vld [vmem:[%s2229_s8 + $0x20] sm:$0xff]  ;;  %v964_v57 = vld [vmem:[%s2229_s8 + $0x30] sm:$0xff] }
  0x86   : > { %1389 = vmatmul.mubr.msk.f32.vlgmr.msra.gmra.mrb[2].mxu0 %vm458_vm1, %v451_v19  ;;  %1424 = vmatpush1.bf16.msra.mxu1 %v1423_v39  ;;  %v959_v39 = vld [vmem:[%s2229_s8 + $0x8] sm:$0xff] }
  0x87   : > { %1428 = vmatpush3.bf16.msra.mxu0 %v1427_v47  ;;  %887 = vmatprep.subr.mxu1 %v882_v37  ;;  %v1457_v41 = vpack.c.bf16 %v961_v40, %v959_v39 }
  0x88   : > { %1430 = vmatprep.subr.bf16.mxu0 %v1429_v48 }
  0x8b   : > { %1432 = vmatpush3.bf16.msra.mxu0 %v1431_v53  ;;  %v965_v53 = vld [vmem:[%s2229_s8 + $0x38] sm:$0xff] }
  0x8c   : > { %1434 = vmatprep.subr.bf16.mxu0 %v1433_v54  ;;  %v1459_v54 = vpack.c.bf16 %v960_v51, %v958_v50  ;;  %v1461_v55 = vpack.c.bf16 %v965_v53, %v963_v52 }
  0x8f   : > { %1436 = vmatpush3.bf16.msra.mxu0 %v1435_v59  ;;  %v1463_v59 = vpack.c.bf16 %v964_v57, %v962_v56 }
  0x90   : > { %1438 = vmatprep.subr.bf16.mxu0 %v1437_v60 }
  0x93   : > { %1440 = vmatpush3.bf16.msra.mxu0 %v1439_v2 }
  0x94   : > { %1442 = vmatprep.subr.bf16.mxu0 %v1441_v3 }
  0x97   : > { %1444 = vmatpush3.bf16.msra.mxu0 %v1443_v8 }
  0x98   : > { %1446 = vmatprep.subr.bf16.mxu0 %v1445_v9 }
  0x9b   : > { %1448 = vmatpush3.bf16.msra.mxu0 %v1447_v14 }
  0x9c   : > { %1450 = vmatprep.subr.bf16.mxu0 %v1449_v15 }
  0x9f   : > { %1452 = vmatpush3.bf16.msra.mxu0 %v1451_v18 }
  0xa0   : > { %1454 = vmatprep.subr.bf16.mxu0 %v1453_v25 }
  0xa3   : > { %1456 = vmatpush3.bf16.msra.mxu0 %v1455_v28 }
 0x14c   : > { %v2119_v21 = vpop.f32.mrb[0].mxu1 }
 0x14d   : > { %v1379_v22 = vpop.f32.mrb[1].mxu1 }
 0x151   : > { %v528_v19 = vpop.f32.mrb[0].mxu0 }
 0x152   : > { %v1368_v20 = vpop.f32.mrb[1].mxu0  ;;  %1297 = vmatmul.mubr.msk.f32.vlgmr.msra.gmra.mrb[2].mxu1 %vm695_vm2, %v528_v19 }
 0x153   : > { %951 = vmatprep.mubr.f32.mxu1 %v1714_v1  ;;  %888 = vmatpush1.msra.mxu1 %v881_v38 }
 0x154   : > { %1458 = vmatprep.subr.bf16.mxu1 %v1457_v41 }
 0x159   : > { %v675_v29 = vpop.f32.mrb[2].mxu0 }
 0x15a   : > { %v1390_v30 = vpop.f32.mrb[3].mxu0 }
 0x225   : > { %v765_v33 = vpop.f32.mrb[2].mxu1 }
 0x226   : > { %v767_v34 = vpop.f32.mrb[3].mxu1  ;;  %v770_v36 = vmul.f32 %v765_v33, %v452_v32 }
 0x227   : > { %v771_v35 = vmul.f32 %v767_v34, %v453_v31 }
 0x229   : > { %868 = vmatprep.mubr.f32.mxu0 %v771_v35 }
 0x22a   : > { %869 = vmatmul.mubr.f32.vlgmr.msra.gmra.mrb[4].mxu0 %v770_v36 }
 0x2fd   : > { %v1355_v42 = vpop.f32.mrb[4].mxu0 }
 0x2fe   : > { %v1356_v43 = vpop.f32.mrb[5].mxu0 }
 0x2ff   : > { %v1357_v44 = vadd.f32 %v1356_v43, %v1355_v42 }
 0x301   : > { %v874_v45 = vmul.f32 0.0625, %v1357_v44 }
 0x303   : > { %v875_v46 = vsub.f32 0.0, %v874_v45 }
 0x305   : > { %v876_v47 = vmul.f32 1.442695, %v875_v46 }
 0x307   : > { %1545 = vpow2.f32 %v876_v47 }
 0x311   : > { %v1546_v48 = vpop.eup %1545 }
 0x312   : > { %v878_v49 = vadd.f32 1.0, %v1546_v48 }
 0x314   : > { %1547 = vrcp.f32 %v878_v49 }
 0x31e   : > { %v1548_v58 = vpop.eup %1547 }
 0x31f   : > { %1298 = vmatmul.mubr.msk.f32.vlgmr.msra.gmra.mrb[4].mxu1 %vm883_vm3, %v1548_v58  ;;  %1118 = vst.msk [vmem:[%s449_s1] sm:$0xff] %vm883_vm3, %v1548_v58  ;;  %s1639_s1 = sshll.u32 %s1715_s23, 4  ;;  %s1640_s1 = int_to_ptr.vmem [resolvable:$false] %s1639_s1 }
 0x320   : > { %1460 = vmatpush1.bf16.msra.mxu1 %v1459_v54  ;;  %1033 = vmatprep.mubr.f32.mxu1 %v1714_v1  ;;  %s1641_s3 = scalar_lea.vmem %s1640_s1, 512  ;;  %p1642_p9 = scmp.lt.s32.totalorder %s2179_s20, %s1640_s1 }
 0x321   : > { %1462 = vmatprep.subr.bf16.mxu1 %v1461_v55  ;;  %p1643_p12 = scmp.lt.s32.totalorder %s1641_s3, %s1635_s17 }
 0x323   : > { %p1644_p2 = por %p1643_p12, %p1642_p9 }
 0x324   : > { %1464 = vmatpush1.bf16.msra.mxu1 %v1463_v59 }
 0x325   : > { %1466 = vmatprep.subr.bf16.mxu1 %v1457_v41  ;;  %p1645_p13 = pnand %p1644_p2, %p1638_p7 }
 0x327   : > { %1299 = vmatmul.mubr.msk.f32.vlgmr.msra.gmra.mrb[6].mxu1 %vm458_vm1, %v675_v29 }
 0x328   : > { %1468 = vmatpush1.bf16.msra.mxu1 %v1459_v54  ;;  %1109 = vmatprep.mubr.f32.mxu1 %v1714_v1 }
 0x329   : > { %1470 = vmatprep.subr.bf16.mxu1 %v1461_v55 }
 0x32c   : > { %1472 = vmatpush1.bf16.msra.mxu1 %v1463_v59 }
 0x32f   : > { %1300 = vmatmul.mubr.msk.f32.vlgmr.msra.gmra.mrb[8].mxu1 %vm458_vm1, %v2119_v21 }
 0x3f2   : > { %v953_v60 = vpop.f32.mrb[4].mxu1 }
 0x3f3   : > { %v955_v61 = vpop.f32.mrb[5].mxu1 }
 0x3fa   : > { %v1035_v62 = vpop.f32.mrb[6].mxu1 }
 0x3fb   : > { %v1040_v63 = vmul.f32 %v1035_v62, %v953_v60  ;;  %v1037_v0 = vpop.f32.mrb[7].mxu1 }
 0x3fc   : > { %v1041_v2 = vmul.f32 %v1037_v0, %v955_v61 }
 0x402   : > { %v1111_v3 = vpop.f32.mrb[8].mxu1 }
 0x403   : > { %v1112_v4 = vadd.f32 %v1111_v3, %v1040_v63  ;;  %v1113_v1 = vpop.f32.mrb[9].mxu1 }
 0x404   : > { %v1114_v5 = vadd.f32 %v1113_v1, %v1041_v2 }
 0x405   : > { %1116 = vst [vmem:[%s430_s13] sm:$0xff] %v1112_v4 }
 0x406   : > { %1117 = vst [vmem:[%s430_s13 + $0x8] sm:$0xff] %v1114_v5 }
 0x407   : > { %1648 = shalt.err (!%p1645_p13)
}
 0x408   : > { %s1649_s27 = scalar_lea.hbm %s2177_s11, 256  ;;  %s1653_s22 = scalar_lea.hbm %s2230_s9, 512 }
 0x409   : > { %p1650_p6 = scmp.ne.s32.totalorder %s2177_s11, %s1649_s27  ;;  %p1654_p5 = scmp.lt.u32.totalorder %s2177_s11, %s2230_s9 }
 0x40a   : > { %p1655_p8 = scmp.lt.u32.totalorder %s1653_s22, %s1649_s27  ;;  %p1657_p0 = scmp.lt.u32.totalorder %s1649_s27, %s2177_s11 }
 0x40b   : > { %p1651_p10 = pnand %p1650_p6, %p2253_p1 }
 0x40c   : > { %p1656_p11 = por %p1655_p8, %p1654_p5 }
 0x40d   : > { %p1652_p4 = pneg %p1651_p10 }
 0x40e   : > { %p1658_p3 = por %p1657_p0, %p1656_p11 }
 0x410   : > { %p1659_p7 = pnand %p1658_p3, %p1652_p4 }
 0x412   : > { %1662 = shalt.err (!%p1659_p7)
}
 0x413   : > { %1483 = dma.vmem_to_hbm [thread:$0]  (%p2253_p1), %s2179_s20, 256, %s2177_s11, %s1120_s18  }
 0x414 PF: > { %s2254_s13 = sld [smem:[#allocation12_spill]]  ;;  %s2255_s24 = sld [smem:[#allocation13_spill]] }
 0x415   : > { %p2257_p12 = scmp.ge.s32.totalorder %s1705_s16, 2 }
 0x41a   : > { %s1153_s30 = sand.u32 1, %s2254_s13   ;;  %p2256_p9 = scmp.ne.s32.totalorder %s2255_s24, 0 }
 0x41b   : > { %s1154_s17 = scalar_lea.sflag [#allocation4], %s1153_s30 }
 0x41c   : > { %p1497_p2 = pnand %p2257_p12, %p2256_p9 }
 0x41e   : > { %1688 = dma.done.wait (!%p1497_p2), %s1154_s17, 256  }
 0x41f   : > { %1690 = vsyncadd (!%p1497_p2), %s1154_s17, 4294967040  ;;  %p25_p13 = scmp.ge.s32.totalorder %s1881_s25, 4   ;;  %s2258_s13 = smov %s1697_s14 }
 0x420   : > { %s2259_s14 = smov %s1701_s15  ;;  %s2260_s15 = smov %s1897_s29 }
 0x421   : > { %s2261_s16 = smov %s1881_s25  ;;  %27 = sbr.rel (!%p25_p13) target bundleno = 9 (0x9), region = 127 }
 0x428   :  { %1166 = vsyncpa [#allocation3], 1 }
 0x429   :  { %1168 = vsyncpa [#allocation3 + $0x1], 1 }
 0x42a   :  { %1169 = vsyncpa [#allocation6], 1 }
 0x42b   :  { %1170 = vsyncpa [#allocation4], 1 }
 0x42c   :  { %1172 = vsyncpa [#allocation4 + $0x1], 1 }

</bundles_post_ra>
